<compile_context>
chip_gen: v6e
topology: v6e:2x2x1
jax: 0.10.0
libtpu: 0.0.40
codegen_flags: <defaults>
</compile_context>

<pallas_src>
import functools

import jax
import jax.numpy as jnp
from jax.experimental import pallas as pl
from jax.experimental.pallas import tpu as pltpu


# ----------------------------------------------------------------------------
# Pallas kernel: whole forward (stand-in encoder + relational head + aggregate)
# ----------------------------------------------------------------------------
def siamese_relational_kernel(
    p_all_ref,    # (2*B*N, Dp)      bf16  stacked patches: img1 rows then img2 rows
    w_all_ref,    # (Dp+2C, Wmax)    bf16  [w_enc ; w1a ; w1b]
    sel_ref,      # (2*B*N, B*N*N)   bf16  fused 0/1 pair-expansion selector
    selsum_ref,   # (B*N*N, B)       bf16  0/1 per-batch pair-sum selector
    packed_ref,   # (rows, 128)      f32   packed small params
    out_ref,      # (1, B)           f32   similarities (single vector store)
    *,
    B: int, N: int, C: int, Hd: int, Dp: int,
):
    BN = B * N
    f32 = jnp.float32
    bf16 = jnp.bfloat16

    # ---- static slices of the packed constant buffers (cheap ref views) ----
    w_enc = w_all_ref[0:Dp, 0:C]                    # (Dp, C)  bf16
    w1a = w_all_ref[Dp:Dp + C, 0:Hd]                # (C, Hd)  bf16
    w1b = w_all_ref[Dp + C:Dp + 2 * C, 0:Hd]        # (C, Hd)  bf16
    b1_col = packed_ref[0:Hd, 0:1]                  # (Hd, 1)  f32
    w2_col = packed_ref[0:Hd, 1:2]                  # (Hd, 1)  f32 (aggregation folded)
    b_enc = packed_ref[Hd:Hd + 1, 0:C]              # (1, C)   f32
    bias_eff = packed_ref[Hd + 1:Hd + 2, 0:B]       # (1, B)   f32 (b2 * NN or b2)

    # ---- stand-in encoder: ONE bf16 MXU matmul over both images & batch ----
    f_all = jnp.maximum(
        jnp.dot(p_all_ref[...], w_enc, preferred_element_type=f32) + b_enc, 0.0)
    f_bf = f_all.astype(bf16)                       # (2*B*N, C)

    # ---- first Linear split across the [f1_i ; f2_j] concat ----
    a = jnp.dot(f_bf[:BN], w1a, preferred_element_type=f32)    # (BN, Hd)
    c = jnp.dot(f_bf[BN:], w1b, preferred_element_type=f32)    # (BN, Hd)

    # ---- fused lane-dense pair expansion: one (Hd,2BN)x(2BN,P) bf16 matmul ----
    ac_t = jnp.transpose(jnp.concatenate([a, c], axis=0)).astype(bf16)   # (Hd, 2BN)
    hidden = jnp.maximum(
        jnp.dot(ac_t, sel_ref[...], preferred_element_type=f32) + b1_col, 0.0)  # (Hd, P)

    # ---- per-batch pair sum on the MXU, then Hd->1 Linear on the VPU/XLU ----
    pooled = jnp.dot(hidden.astype(bf16), selsum_ref[...],
                     preferred_element_type=f32)                # (Hd, B)
    out_ref[...] = jnp.sum(pooled * w2_col, axis=0, keepdims=True) + bias_eff


# ----------------------------------------------------------------------------
# Glue (plain JAX): patch extraction, parameter setup, closure-building wrapper
# ----------------------------------------------------------------------------
def _extract_patches(img, patch):
    """NCHW image -> (B, N, Dp) non-overlapping patches, Dp = C*patch*patch."""
    B, C, H, W = img.shape
    h, w = H // patch, W // patch
    x = img.reshape(B, C, h, patch, w, patch)
    x = jnp.transpose(x, (0, 2, 4, 1, 3, 5))            # (B, h, w, C, p, p)
    return x.reshape(B, h * w, C * patch * patch)


def init_params(key, *, patch, in_ch=3, feature_dim=32, relation_hidden_dim=32):
    """Deterministic synthetic parameters (shapes follow the module's __init__)."""
    dp = in_ch * patch * patch
    ks = jax.random.split(key, 6)
    s = 0.1
    w_enc = s * jax.random.normal(ks[0], (dp, feature_dim), jnp.float32)
    b_enc = s * jax.random.normal(ks[1], (1, feature_dim), jnp.float32)
    # relation_head Linear(2*C -> Hd) split into the f1 / f2 halves
    w1 = s * jax.random.normal(ks[2], (2 * feature_dim, relation_hidden_dim), jnp.float32)
    b1 = s * jax.random.normal(ks[3], (1, relation_hidden_dim), jnp.float32)
    # relation_head Linear(Hd -> 1)
    w2 = s * jax.random.normal(ks[4], (1, relation_hidden_dim), jnp.float32)
    b2 = s * jax.random.normal(ks[5], (1, 1), jnp.float32)
    return dict(
        w_enc=w_enc, b_enc=b_enc,
        w1a=w1[:feature_dim], w1b=w1[feature_dim:],
        b1=b1, w2=w2, b2=b2,
    )


def make_forward(params, *, B, H, W, patch, aggregation="sum"):
    """Precompute ALL constants once and return a jitted forward(img1, img2)."""
    assert aggregation in ("sum", "mean")
    Dp, C = params["w_enc"].shape
    Hd = params["b1"].shape[1]
    N = (H // patch) * (W // patch)
    NN = N * N
    P = B * NN
    BN = B * N
    assert C <= 128 and Hd <= 128 and B <= 128

    # ---- packed bf16 weight block [w_enc ; w1a ; w1b] ----
    Wmax = max(C, Hd)

    def _padc(w):
        return jnp.pad(w, ((0, 0), (0, Wmax - w.shape[1])))

    w_all = jnp.concatenate(
        [_padc(params["w_enc"]), _padc(params["w1a"]), _padc(params["w1b"])],
        axis=0).astype(jnp.bfloat16)                               # (Dp+2C, Wmax)

    # ---- 0/1 selectors (exactly representable in bf16) ----
    # pair index k = b*N*N + i*N + j
    k = jnp.arange(P, dtype=jnp.int32)
    r = jnp.arange(BN, dtype=jnp.int32)
    sel_a = r[:, None] == (k // N)[None, :]                         # picks f1 row b*N+i
    sel_c = r[:, None] == ((k // NN) * N + k % N)[None, :]          # picks f2 row b*N+j
    sel = jnp.concatenate([sel_a, sel_c], axis=0).astype(jnp.bfloat16)       # (2BN, P)
    selsum = ((k // NN)[:, None]
              == jnp.arange(B, dtype=jnp.int32)[None, :]).astype(jnp.bfloat16)  # (P, B)

    # ---- packed small params: b1 col, w2_eff col, b_enc row, folded bias ----
    rows = ((Hd + 2 + 7) // 8) * 8
    scale = (1.0 / NN) if aggregation == "mean" else 1.0
    bias_eff = params["b2"][0, 0] * (1.0 if aggregation == "mean" else float(NN))
    packed = jnp.zeros((rows, 128), jnp.float32)
    packed = packed.at[0:Hd, 0].set(params["b1"][0])
    packed = packed.at[0:Hd, 1].set(params["w2"][0] * scale)
    packed = packed.at[Hd, 0:C].set(params["b_enc"][0])
    packed = packed.at[Hd + 1, 0:B].set(bias_eff)

    kernel = functools.partial(
        siamese_relational_kernel, B=B, N=N, C=C, Hd=Hd, Dp=Dp)
    vm = pltpu.MemorySpace.VMEM

    # Gridless, full-array VMEM blocks: total resident data is ~130 KB, far
    # below VMEM on v5e/v6e/v7x, so a grid would only add per-step overhead.
    call = pl.pallas_call(
        kernel,
        out_shape=jax.ShapeDtypeStruct((1, B), jnp.float32),
        in_specs=[pl.BlockSpec(memory_space=vm)] * 5,
        out_specs=pl.BlockSpec(memory_space=vm),
    )

    @jax.jit
    def forward(img1, img2):
        p1 = _extract_patches(img1, patch)                         # (B, N, Dp)
        p2 = _extract_patches(img2, patch)
        p_all = jnp.concatenate([p1, p2], axis=0).reshape(2 * BN, Dp)
        p_all = p_all.astype(jnp.bfloat16)                         # fuses with the reshape
        out = call(p_all, w_all, sel, selsum, packed)              # (1, B)
        return out.reshape(B, 1)                                   # layout plumbing

    return forward


# ----------------------------------------------------------------------------
# Pure-JAX f32 reference (mirrors the torch forward with the same stand-in encoder)
# ----------------------------------------------------------------------------
def reference_forward(img1, img2, params, *, patch, aggregation="sum"):
    def encode(img):
        p = _extract_patches(img, patch)
        # already (B, N, C): same as view(B, C, N).permute(0, 2, 1) of NCHW features
        return jnp.maximum(p @ params["w_enc"] + params["b_enc"], 0.0)

    f1 = encode(img1)
    f2 = encode(img2)
    B, N, C = f1.shape
    f1e = jnp.broadcast_to(f1[:, :, None, :], (B, N, N, C))
    f2e = jnp.broadcast_to(f2[:, None, :, :], (B, N, N, C))
    pairs = jnp.concatenate([f1e, f2e], axis=-1).reshape(B, N * N, 2 * C)
    w1 = jnp.concatenate([params["w1a"], params["w1b"]], axis=0)       # (2C, Hd)
    h = jnp.maximum(pairs @ w1 + params["b1"], 0.0)
    scores = (h @ params["w2"].T + params["b2"][0, 0]).reshape(B, N * N)
    if aggregation == "sum":
        return scores.sum(axis=1, keepdims=True)
    return scores.mean(axis=1, keepdims=True)


if __name__ == "__main__":
    key = jax.random.PRNGKey(0)
    k_img1, k_img2, k_params = jax.random.split(key, 3)

    B, H, W, PATCH = 2, 32, 32, 8          # -> N = (32/8)^2 = 16 locations
    img1 = jax.random.normal(k_img1, (B, 3, H, W), jnp.float32)
    img2 = jax.random.normal(k_img2, (B, 3, H, W), jnp.float32)
    params = init_params(k_params, patch=PATCH, feature_dim=32, relation_hidden_dim=32)

    for agg in ("sum", "mean"):
        fwd = make_forward(params, B=B, H=H, W=W, patch=PATCH, aggregation=agg)
        out = jax.block_until_ready(fwd(img1, img2))
        ref = reference_forward(img1, img2, params, patch=PATCH, aggregation=agg)
        assert out.shape == (B, 1), out.shape
        # Kernel feeds the MXU bf16 operands (f32 accumulation); reference is f32,
        # so the tolerance is loosened accordingly.
        if not jnp.allclose(out, ref, rtol=5e-2, atol=5e-2):
            raise AssertionError(f"Pallas/reference mismatch ({agg}):\n{out}\nvs\n{ref}")

    print("KERNEL_OK")
</pallas_src>

<mosaic_0001>
module attributes {stable_mosaic.version = 11 : i64} {
  func.func @siamese_relational_kernel(%arg0: memref<64x192xbf16, #tpu.memory_space<vmem>>, %arg1: memref<256x32xbf16, #tpu.memory_space<vmem>>, %arg2: memref<64x512xbf16, #tpu.memory_space<vmem>>, %arg3: memref<512x2xbf16, #tpu.memory_space<vmem>>, %arg4: memref<40x128xf32, #tpu.memory_space<vmem>>, %arg5: memref<1x2xf32, #tpu.memory_space<vmem>>) attributes {dimension_semantics = [], scalar_prefetch = 0 : i64, scratch_operands = 0 : i64, tpu.core_type = #tpu.core_type<tc>} {
    %c0 = arith.constant 0 : index
    %c0_0 = arith.constant 0 : index
    %0 = vector.load %arg1[%c0, %c0_0] : memref<256x32xbf16, #tpu.memory_space<vmem>>, vector<192x32xbf16>
    %c192 = arith.constant 192 : index
    %c0_1 = arith.constant 0 : index
    %1 = vector.load %arg1[%c192, %c0_1] : memref<256x32xbf16, #tpu.memory_space<vmem>>, vector<32x32xbf16>
    %c224 = arith.constant 224 : index
    %c0_2 = arith.constant 0 : index
    %2 = vector.load %arg1[%c224, %c0_2] : memref<256x32xbf16, #tpu.memory_space<vmem>>, vector<32x32xbf16>
    %c0_3 = arith.constant 0 : index
    %c0_4 = arith.constant 0 : index
    %3 = vector.load %arg4[%c0_3, %c0_4] : memref<40x128xf32, #tpu.memory_space<vmem>>, vector<32x1xf32>
    %c0_5 = arith.constant 0 : index
    %c1 = arith.constant 1 : index
    %4 = vector.load %arg4[%c0_5, %c1] : memref<40x128xf32, #tpu.memory_space<vmem>>, vector<32x1xf32>
    %c32 = arith.constant 32 : index
    %c0_6 = arith.constant 0 : index
    %5 = vector.load %arg4[%c32, %c0_6] : memref<40x128xf32, #tpu.memory_space<vmem>>, vector<1x32xf32>
    %c33 = arith.constant 33 : index
    %c0_7 = arith.constant 0 : index
    %6 = vector.load %arg4[%c33, %c0_7] : memref<40x128xf32, #tpu.memory_space<vmem>>, vector<1x2xf32>
    %c0_8 = arith.constant 0 : index
    %c0_9 = arith.constant 0 : index
    %7 = vector.load %arg0[%c0_8, %c0_9] : memref<64x192xbf16, #tpu.memory_space<vmem>>, vector<64x192xbf16>
    %cst = arith.constant dense<0.000000e+00> : vector<64x32xf32>
    %8 = tpu.matmul %7, %0, %cst {dimension_numbers = #tpu.dot_dimension_numbers<[1], [0], [0], [1], [0, 0, 1, 1], [], []>} : vector<64x192xbf16>, vector<192x32xbf16>, vector<64x32xf32> -> vector<64x32xf32>
    %9 = vector.broadcast %5 : vector<1x32xf32> to vector<64x32xf32>
    %10 = arith.addf %8, %9 : vector<64x32xf32>
    %cst_10 = arith.constant 0.000000e+00 : f32
    %11 = vector.broadcast %cst_10 : f32 to vector<64x32xf32>
    %12 = arith.maximumf %10, %11 : vector<64x32xf32>
    %13 = arith.truncf %12 : vector<64x32xf32> to vector<64x32xbf16>
    %14 = vector.extract_strided_slice %13 {offsets = [0, 0], sizes = [32, 32], strides = [1, 1]} : vector<64x32xbf16> to vector<32x32xbf16>
    %cst_11 = arith.constant dense<0.000000e+00> : vector<32x32xf32>
    %15 = tpu.matmul %14, %1, %cst_11 {dimension_numbers = #tpu.dot_dimension_numbers<[1], [0], [0], [1], [0, 0, 1, 1], [], []>} : vector<32x32xbf16>, vector<32x32xbf16>, vector<32x32xf32> -> vector<32x32xf32>
    %16 = vector.extract_strided_slice %13 {offsets = [32, 0], sizes = [32, 32], strides = [1, 1]} : vector<64x32xbf16> to vector<32x32xbf16>
    %cst_12 = arith.constant dense<0.000000e+00> : vector<32x32xf32>
    %17 = tpu.matmul %16, %2, %cst_12 {dimension_numbers = #tpu.dot_dimension_numbers<[1], [0], [0], [1], [0, 0, 1, 1], [], []>} : vector<32x32xbf16>, vector<32x32xbf16>, vector<32x32xf32> -> vector<32x32xf32>
    %18 = tpu.concatenate %15, %17 in 0 : vector<32x32xf32>, vector<32x32xf32> -> vector<64x32xf32>
    %19 = tpu.transpose %18, [1, 0] : vector<64x32xf32> -> vector<32x64xf32>
    %20 = arith.truncf %19 : vector<32x64xf32> to vector<32x64xbf16>
    %c0_13 = arith.constant 0 : index
    %c0_14 = arith.constant 0 : index
    %21 = vector.load %arg2[%c0_13, %c0_14] : memref<64x512xbf16, #tpu.memory_space<vmem>>, vector<64x512xbf16>
    %cst_15 = arith.constant dense<0.000000e+00> : vector<32x512xf32>
    %22 = tpu.matmul %20, %21, %cst_15 {dimension_numbers = #tpu.dot_dimension_numbers<[1], [0], [0], [1], [0, 0, 1, 1], [], []>} : vector<32x64xbf16>, vector<64x512xbf16>, vector<32x512xf32> -> vector<32x512xf32>
    %23 = vector.broadcast %3 : vector<32x1xf32> to vector<32x512xf32>
    %24 = arith.addf %22, %23 : vector<32x512xf32>
    %cst_16 = arith.constant 0.000000e+00 : f32
    %25 = vector.broadcast %cst_16 : f32 to vector<32x512xf32>
    %26 = arith.maximumf %24, %25 : vector<32x512xf32>
    %27 = arith.truncf %26 : vector<32x512xf32> to vector<32x512xbf16>
    %c0_17 = arith.constant 0 : index
    %c0_18 = arith.constant 0 : index
    %28 = vector.load %arg3[%c0_17, %c0_18] : memref<512x2xbf16, #tpu.memory_space<vmem>>, vector<512x2xbf16>
    %cst_19 = arith.constant dense<0.000000e+00> : vector<32x2xf32>
    %29 = tpu.matmul %27, %28, %cst_19 {dimension_numbers = #tpu.dot_dimension_numbers<[1], [0], [0], [1], [0, 0, 1, 1], [], []>} : vector<32x512xbf16>, vector<512x2xbf16>, vector<32x2xf32> -> vector<32x2xf32>
    %30 = vector.broadcast %4 : vector<32x1xf32> to vector<32x2xf32>
    %31 = arith.mulf %29, %30 : vector<32x2xf32>
    %cst_20 = arith.constant dense<0.000000e+00> : vector<2xf32>
    %32 = vector.multi_reduction <add>, %31, %cst_20 [0] : vector<32x2xf32> to vector<2xf32>
    %33 = vector.shape_cast %32 : vector<2xf32> to vector<1x2xf32>
    %34 = arith.addf %33, %6 : vector<1x2xf32>
    %c0_21 = arith.constant 0 : index
    %c0_22 = arith.constant 0 : index
    %35 = vector.load %arg5[%c0_21, %c0_22] : memref<1x2xf32, #tpu.memory_space<vmem>>, vector<1x2xf32>
    tpu.vector_store %arg5[%c0_21, %c0_22], %34 {strides = array<i32>} : memref<1x2xf32, #tpu.memory_space<vmem>>, vector<1x2xf32>,
    return
  }
}

</mosaic_0001>

<bundles_post_ra>
// kernel: forward.1
= control target key start
LH: loop header
LB: loop body
LE: loop exit
PB: predicated region body
PF: predicated region fallthrough
CT: control target
= control target key end

     0   :  { %v1374_v1 = vmov 0   ;;  %vm180_vm0 = vcmask 523264   ;;  %s1689_s0 = inlined_call_operand.vmem [shape: bf16[64,192], index: 0, kind: input, shape index: {}]   ;;  %s1690_s1 = inlined_call_operand.vmem [shape: bf16[256,32], index: 1, kind: input, shape index: {}]   ;;  %s1691_s2 = inlined_call_operand.vmem [shape: bf16[64,512], index: 2, kind: input, shape index: {}]   ;;  %s1692_s3 = inlined_call_operand.vmem [shape: bf16[512,2], index: 3, kind: input, shape index: {}]   ;;  %s1693_s4 = inlined_call_operand.vmem [shape: f32[40,128], index: 4, kind: input, shape index: {}]   ;;  %s1694_s5 = inlined_call_operand.hbm [shape: f32[1,2], index: 5, kind: output, shape index: {}]  }
   0x1   :  { %v1268_v0 = vld [vmem:[%s1690_s1 + $0x38] sm:$0xff]   ;;  %193 = vmatprep.subr.bf16.mxu0 %v1374_v1  ;;  %1265 = vset.pattern.permute.xlu1 %v1374_v1  ;;  %v1269_v2 = vld [vmem:[%s1690_s1 + $0x30] sm:$0xff]   ;;  %v1270_v3 = vld [vmem:[%s1690_s1 + $0x28] sm:$0xff]  }
   0x2   :  { %194 = vmatpush1.bf16.msra.mxu0 %v1268_v0  ;;  %v1271_v4 = vld [vmem:[%s1690_s1 + $0x20] sm:$0xff]   ;;  %v1272_v6 = vld [vmem:[%s1690_s1 + $0x18] sm:$0xff]   ;;  %v1273_v7 = vld [vmem:[%s1690_s1 + $0x10] sm:$0xff]  }
   0x3   :  { %195 = vmatprep.subr.bf16.mxu0 %v1374_v1  ;;  %v1282_v5 = vld [vmem:[%s1689_s0 + $0x4] ss:$8 sps:$4 sm:$0xff]   ;;  %v1276_v10 = vld [vmem:[%s1690_s1 + $0x58] sm:$0xff]   ;;  %v1277_v11 = vld [vmem:[%s1690_s1 + $0x50] sm:$0xff]  }
   0x4   :  { %1117 = vmatprep.mubr.msk.bf16.mxu0 %vm180_vm0, %v1282_v5  ;;  %v1274_v8 = vld [vmem:[%s1690_s1 + $0x8] sm:$0xff]   ;;  %v1275_v9 = vld [vmem:[%s1690_s1] sm:$0xff]   ;;  %v1283_v15 = vld [vmem:[%s1689_s0 + $0x14] ss:$8 sps:$4 sm:$0xff]  }
   0x5   :  { %v1278_v12 = vld [vmem:[%s1690_s1 + $0x48] sm:$0xff]   ;;  %v1279_v13 = vld [vmem:[%s1690_s1 + $0x40] sm:$0xff]  }
   0x6   :  { %196 = vmatpush1.bf16.msra.mxu0 %v1269_v2  ;;  %v1280_v14 = vld [vmem:[%s1689_s0] ss:$8 sps:$4 sm:$0xff]  }
   0x7   :  { %197 = vmatprep.subr.bf16.mxu0 %v1374_v1 }
   0xa   :  { %198 = vmatpush1.bf16.msra.mxu0 %v1270_v3 }
   0xb   :  { %199 = vmatprep.subr.bf16.mxu0 %v1374_v1 }
   0xe   :  { %200 = vmatpush1.bf16.msra.mxu0 %v1271_v4 }
   0xf   :  { %201 = vmatprep.subr.bf16.mxu0 %v1374_v1 }
  0x12   :  { %202 = vmatpush1.bf16.msra.mxu0 %v1272_v6 }
  0x13   :  { %203 = vmatprep.subr.bf16.mxu0 %v1374_v1 }
  0x16   :  { %204 = vmatpush1.bf16.msra.mxu0 %v1273_v7 }
  0x17   :  { %205 = vmatprep.subr.bf16.mxu0 %v1374_v1 }
  0x1a   :  { %206 = vmatpush1.bf16.msra.mxu0 %v1274_v8 }
  0x1b   :  { %207 = vmatprep.subr.bf16.mxu0 %v1374_v1 }
  0x1e   :  { %208 = vmatpush1.bf16.msra.mxu0 %v1275_v9 }
  0x1f   :  { %217 = vmatprep.subr.bf16.mxu0 %v1374_v1 }
  0x22   :  { %218 = vmatpush2.bf16.msra.mxu0 %v1276_v10 }
  0x23   :  { %219 = vmatprep.subr.bf16.mxu0 %v1374_v1 }
  0x26   :  { %220 = vmatpush2.bf16.msra.mxu0 %v1277_v11 }
  0x27   :  { %221 = vmatprep.subr.bf16.mxu0 %v1374_v1 }
  0x2a   :  { %222 = vmatpush2.bf16.msra.mxu0 %v1278_v12 }
  0x2b   :  { %223 = vmatprep.subr.bf16.mxu0 %v1374_v1 }
  0x2e   :  { %224 = vmatpush2.bf16.msra.mxu0 %v1279_v13 }
  0x2f   :  { %10 = vsyncpa [#allocation3], 0  ;;  %v1285_v16 = vld [vmem:[%s1689_s0 + $0x10] ss:$8 sps:$4 sm:$0xff]   ;;  %v1286_v17 = vld [vmem:[%s1689_s0 + $0x24] ss:$8 sps:$4 sm:$0xff]  }
  0x30   :  { %v1288_v18 = vld [vmem:[%s1689_s0 + $0x20] ss:$8 sps:$4 sm:$0xff]   ;;  %v1289_v19 = vld [vmem:[%s1689_s0 + $0x34] ss:$8 sps:$4 sm:$0xff]   ;;  %v1291_v20 = vld [vmem:[%s1689_s0 + $0x30] ss:$8 sps:$4 sm:$0xff]  }
  0x31   :  { %226 = vmatmul.mubr.bf16.vlgmr.msra.gmra.mxu0 %v1280_v14  ;;  %v1292_v21 = vld [vmem:[%s1690_s1 + $0x68] sm:$0xff]   ;;  %v1293_v22 = vld [vmem:[%s1690_s1 + $0x60] sm:$0xff]   ;;  %v1294_v23 = vld [vmem:[%s1690_s1 + $0x78] sm:$0xff]   ;;  %vm282_vm1 = vcmask 261120   ;;  %vm1065_vm2 = vcmask 15360   ;;  %s1376_s13 = smov [#allocation2]  }
  0x32   :  { %1118 = vmatprep.mubr.msk.bf16.mxu0 %vm180_vm0, %v1283_v15  ;;  %1245 = vmatprep.subr.bf16.mxu1 %v1292_v21  ;;  %v1096_v24 = vld [vmem:[%s1693_s4 + $0x20] ss:$0 sm:$0xff]  ;;  %v1295_v44 = vld [vmem:[%s1690_s1 + $0x70] sm:$0xff]   ;;  %v1310_v10 = vld [vmem:[%s1691_s2 + $0x6c] ss:$16 sps:$4 sm:$0xff]   ;;  %s1088_s14 = sshll.u32 %s1376_s13, 4  ;;  %s1089_s14 = int_to_ptr.vmem [resolvable:$true] %s1088_s14 }
  0x33   :  { %1246 = vmatpush3.bf16.msra.mxu1 %v1292_v21  ;;  %v1296_v62 = vld [vmem:[%s1691_s2 + $0x60] ss:$16 sps:$4 sm:$0xff]   ;;  %v1298_v63 = vld [vmem:[%s1691_s2 + $0x64] ss:$16 sps:$4 sm:$0xff]   ;;  %vm1080_vm3 = vcmask 8192   ;;  %s1352_s0 = scalar_lea.vmem %s1089_s14, 16  ;;  %p1357_p1 = scmp.lt.s32.totalorder %s1089_s14, %s1089_s14 }
  0x34   :  { %1247 = vmatprep.subr.bf16.mxu1 %v1293_v22  ;;  %v1301_v0 = vld [vmem:[%s1691_s2 + $0x44] ss:$16 sps:$4 sm:$0xff]   ;;  %v1299_v2 = vld [vmem:[%s1691_s2 + $0x40] ss:$16 sps:$4 sm:$0xff]   ;;  %p1353_p0 = scmp.ne.s32.totalorder %s1089_s14, %s1352_s0  ;;  %s1356_s15 = scalar_lea.vmem %s1089_s14, 32 }
  0x35   :  { %v1304_v3 = vld [vmem:[%s1691_s2 + $0x24] ss:$16 sps:$4 sm:$0xff]   ;;  %v1302_v4 = vld [vmem:[%s1691_s2 + $0x20] ss:$16 sps:$4 sm:$0xff]   ;;  %p1358_p2 = scmp.lt.s32.totalorder %s1356_s15, %s1352_s0 }
  0x36   :  { %v1305_v5 = vld [vmem:[%s1691_s2] ss:$16 sps:$4 sm:$0xff]   ;;  %v1307_v6 = vld [vmem:[%s1691_s2 + $0x4] ss:$16 sps:$4 sm:$0xff]  }
  0x37   :  { %1248 = vmatpush3.bf16.msra.mxu1 %v1293_v22  ;;  %v1323_v21 = vld [vmem:[%s1692_s3 + $0x30] sm:$0xff]   ;;  %v1324_v22 = vld [vmem:[%s1692_s3 + $0x68] sm:$0xff]   ;;  %p1359_p3 = por %p1358_p2, %p1357_p1 }
  0x38   :  { %1253 = vmatprep.subr.bf16.mxu1 %v1294_v23 }
  0x39   :  { %234 = vmatmul.mubr.bf16.gmra.mxu0 %v1285_v16  ;;  %v1534_v16 = vld [vmem:[%s1693_s4] sm:$0xff]  ;;  %p1360_p4 = pnand %p1359_p3, %p1353_p0 }
  0x3a   :  { %1119 = vmatprep.mubr.msk.bf16.mxu0 %vm180_vm0, %v1286_v17  ;;  %457 = vperm.xlu1 %1265, %v1534_v16   ;;  %v1320_v17 = vld [vmem:[%s1692_s3 + $0x78] sm:$0xff]  }
  0x3b   :  { %1189 = vmatprep.subr.bf16.mxu0 %v1320_v17 }
  0x41   :  { %242 = vmatmul.mubr.bf16.gmra.mxu0 %v1288_v18  ;;  %v1321_v18 = vld [vmem:[%s1692_s3 + $0x38] sm:$0xff]  }
  0x42   :  { %1120 = vmatprep.mubr.msk.bf16.mxu0 %vm180_vm0, %v1289_v19  ;;  %v1546_v19 = vld [vmem:[%s1693_s4 + $0x8] sm:$0xff]  ;;  %1190 = vmatpush3.bf16.msra.mxu0 %v1321_v18 }
  0x43   :  { %462 = vperm.xlu1 %1265, %v1546_v19  }
  0x49   :  { %250 = vmatmul.mubr.bf16.gmra.mxu0 %v1291_v20  ;;  %v1322_v20 = vld [vmem:[%s1692_s3 + $0x70] sm:$0xff]  }
  0x4a   :  { %1191 = vmatprep.subr.bf16.mxu0 %v1322_v20 }
  0x4b   :  { %1192 = vmatpush3.bf16.msra.mxu0 %v1323_v21 }
  0x4c   :  { %1193 = vmatprep.subr.bf16.mxu0 %v1324_v22 }
  0xf1   :  { %v227_v25 = vpop.f32.mrf.mxu0 }
  0xf2   :  { %v228_v27 = vadd.f32 %v1096_v24, %v227_v25  ;;  %v1326_v25 = vld [vmem:[%s1692_s3 + $0x60] sm:$0xff]  }
  0xf3   :  { %v229_v26 = vpop.f32.mrf.mxu0 }
  0xf4   :  { %v258_v31 = vmax.f32 %v228_v27, 0.0  ;;  %v1573_v26 = vld [vmem:[%s1693_s4 + $0x18] sm:$0xff]  ;;  %v1327_v27 = vld [vmem:[%s1692_s3 + $0x20] sm:$0xff]  }
  0xf5   :  { %v230_v28 = vpop.f32.mrf.mxu0 }
  0xf6   :  { %v231_v29 = vadd.f32 %v1096_v24, %v230_v28  ;;  %v1328_v28 = vld [vmem:[%s1692_s3 + $0x58] sm:$0xff]  }
  0xf7   :  { %v232_v30 = vpop.f32.mrf.mxu0 }
  0xf8   :  { %v259_v32 = vmax.f32 %v231_v29, 0.0  ;;  %v1330_v29 = vld [vmem:[%s1692_s3 + $0x18] sm:$0xff]  }
  0xf9   :  { %v235_v33 = vpop.f32.mrf.mxu0 }
  0xfa   :  { %v266_v34 = vpack.c.bf16 %v259_v32, %v258_v31  ;;  %v236_v36 = vadd.f32 %v1096_v24, %v235_v33  ;;  %v1308_v32 = vld [vmem:[%s1691_s2 + $0x68] ss:$16 sps:$4 sm:$0xff]  }
  0xfb   :  { %v237_v35 = vpop.f32.mrf.mxu0 }
  0xfc   :  { %1249 = vmatprep.mubr.msk.bf16.mxu1 %vm282_vm1, %v266_v34  ;;  %v260_v40 = vmax.f32 %v236_v36, 0.0  ;;  %v1313_v34 = vld [vmem:[%s1691_s2 + $0x4c] ss:$16 sps:$4 sm:$0xff]   ;;  %v1311_v36 = vld [vmem:[%s1691_s2 + $0x48] ss:$16 sps:$4 sm:$0xff]  }
  0xfd   :  { %v238_v37 = vpop.f32.mrf.mxu0 }
  0xfe   :  { %v239_v38 = vadd.f32 %v1096_v24, %v238_v37  ;;  %v1316_v37 = vld [vmem:[%s1691_s2 + $0x2c] ss:$16 sps:$4 sm:$0xff]  }
  0xff   :  { %v240_v39 = vpop.f32.mrf.mxu0 }
 0x100   :  { %v261_v41 = vmax.f32 %v239_v38, 0.0  ;;  %v1314_v39 = vld [vmem:[%s1691_s2 + $0x28] ss:$16 sps:$4 sm:$0xff]  }
 0x101   :  { %v243_v42 = vpop.f32.mrf.mxu0 }
 0x102   :  { %v267_v43 = vpack.c.bf16 %v261_v41, %v260_v40  ;;  %v244_v46 = vadd.f32 %v1096_v24, %v243_v42  ;;  %v1319_v41 = vld [vmem:[%s1691_s2 + $0xc] ss:$16 sps:$4 sm:$0xff]   ;;  %v1317_v42 = vld [vmem:[%s1691_s2 + $0x8] ss:$16 sps:$4 sm:$0xff]  }
 0x103   :  { %v245_v45 = vpop.f32.mrf.mxu0 }
 0x104   :  { %1250 = vmatmul.mubr.msk.bf16.vlgmr.msra.gmra.mxu1 %vm282_vm1, %v267_v43  ;;  %v262_v50 = vmax.f32 %v244_v46, 0.0  ;;  %v1329_v43 = vld [vmem:[%s1692_s3 + $0xf8] sm:$0xff]   ;;  %v1332_v45 = vld [vmem:[%s1692_s3 + $0x50] sm:$0xff]  }
 0x105   :  { %v246_v47 = vpop.f32.mrf.mxu0  ;;  %1254 = vmatpush3.bf16.msra.mxu1 %v1294_v23  ;;  %v1561_v23 = vld [vmem:[%s1693_s4 + $0x10] sm:$0xff] }
 0x106   :  { %v247_v48 = vadd.f32 %v1096_v24, %v246_v47  ;;  %1255 = vmatprep.subr.bf16.mxu1 %v1295_v44  ;;  %467 = vperm.xlu1 %1265, %v1561_v23   ;;  %v1333_v46 = vld [vmem:[%s1692_s3 + $0xf0] sm:$0xff]  }
 0x107   :  { %v248_v49 = vpop.f32.mrf.mxu0  ;;  %v1334_v47 = vld [vmem:[%s1692_s3 + $0x10] sm:$0xff]  }
 0x108   :  { %v263_v51 = vmax.f32 %v247_v48, 0.0  ;;  %v1335_v48 = vld [vmem:[%s1692_s3 + $0xb0] sm:$0xff]   ;;  %v1337_v49 = vld [vmem:[%s1692_s3 + $0xe8] sm:$0xff]  }
 0x109   :  { %v251_v52 = vpop.f32.mrf.mxu0  ;;  %1256 = vmatpush3.bf16.msra.mxu1 %v1295_v44  ;;  %v1331_v44 = vld [vmem:[%s1692_s3 + $0xb8] sm:$0xff]  }
 0x10a   :  { %v268_v53 = vpack.c.bf16 %v263_v51, %v262_v50  ;;  %v252_v55 = vadd.f32 %v1096_v24, %v251_v52  ;;  %569 = vmatprep.subr.bf16.mxu1 %v1298_v63  ;;  %472 = vperm.xlu1 %1265, %v1573_v26   ;;  %v1338_v50 = vld [vmem:[%s1692_s3 + $0x8] sm:$0xff]   ;;  %v1340_v52 = vld [vmem:[%s1692_s3 + $0x40] sm:$0xff]  }
 0x10b   :  { %v253_v54 = vpop.f32.mrf.mxu0  ;;  %v1339_v51 = vld [vmem:[%s1692_s3 + $0xa8] sm:$0xff]   ;;  %v1351_v63 = vld [vmem:[%s1692_s3 + $0x80] sm:$0xff]  }
 0x10c   :  { %1257 = vmatprep.mubr.msk.bf16.mxu1 %vm282_vm1, %v268_v53  ;;  %v264_v59 = vmax.f32 %v252_v55, 0.0  ;;  %v1341_v53 = vld [vmem:[%s1692_s3 + $0xe0] sm:$0xff]  }
 0x10d   :  { %v254_v56 = vpop.f32.mrf.mxu0  ;;  %v1342_v54 = vld [vmem:[%s1692_s3] sm:$0xff]  }
 0x10e   :  { %v255_v57 = vadd.f32 %v1096_v24, %v254_v56  ;;  %v1325_v24 = vld [vmem:[%s1692_s3 + $0x28] sm:$0xff]   ;;  %v1343_v55 = vld [vmem:[%s1692_s3 + $0xa0] sm:$0xff]   ;;  %v1344_v56 = vld [vmem:[%s1692_s3 + $0xd8] sm:$0xff]  }
 0x10f   :  { %v256_v58 = vpop.f32.mrf.mxu0  ;;  %1194 = vmatpush3.bf16.msra.mxu0 %v1325_v24 }
 0x110   :  { %v265_v60 = vmax.f32 %v255_v57, 0.0  ;;  %1195 = vmatprep.subr.bf16.mxu0 %v1326_v25  ;;  %v1345_v57 = vld [vmem:[%s1692_s3 + $0x98] sm:$0xff]   ;;  %v1346_v58 = vld [vmem:[%s1692_s3 + $0xd0] sm:$0xff]  }
 0x112   :  { %v269_v61 = vpack.c.bf16 %v265_v60, %v264_v59  ;;  %v1347_v59 = vld [vmem:[%s1692_s3 + $0x90] sm:$0xff]   ;;  %v1348_v60 = vld [vmem:[%s1692_s3 + $0xc8] sm:$0xff]  }
 0x113   :  { %1196 = vmatpush3.bf16.msra.mxu0 %v1327_v27 }
 0x114   :  { %1258 = vmatmul.mubr.msk.bf16.vlgmr.msra.gmra.mxu1 %vm282_vm1, %v269_v61  ;;  %1197 = vmatprep.subr.bf16.mxu0 %v1328_v28  ;;  %v1349_v61 = vld [vmem:[%s1692_s3 + $0x88] sm:$0xff]  }
 0x115   :  { %593 = vmatprep.mubr.bf16.mxu1 %v1374_v1  ;;  %570 = vmatpush1.bf16.msra.mxu1 %v1296_v62  ;;  %v1350_v62 = vld [vmem:[%s1692_s3 + $0xc0] sm:$0xff]  }
 0x116   :  { %571 = vmatprep.subr.bf16.mxu1 %v1301_v0  ;;  %v1375_v0 = vmov 1  }
 0x117   :  { %1198 = vmatpush3.bf16.msra.mxu0 %v1330_v29  ;;  %1266 = vset.pattern.permute.xlu1 %v1375_v0 }
 0x118   :  { %1199 = vmatprep.subr.bf16.mxu0 %v1332_v45  ;;  %1046 = vperm.xlu1 %1266, %v1534_v16  }
 0x119   :  { %572 = vmatpush1.bf16.msra.mxu1 %v1299_v2  ;;  %v458_v2 = vpop.permute.xlu1 %457 }
 0x11a   :  { %573 = vmatprep.subr.bf16.mxu1 %v1304_v3 }
 0x11b   :  { %1200 = vmatpush3.bf16.msra.mxu0 %v1334_v47 }
 0x11c   :  { %1050 = vperm.xlu1 %1266, %v1546_v19  }
 0x11d   :  { %574 = vmatpush1.bf16.msra.mxu1 %v1302_v4  ;;  %v463_v3 = vpop.permute.xlu1 %462 }
 0x11e   :  { %575 = vmatprep.subr.bf16.mxu1 %v1307_v6 }
 0x120   :  { %1054 = vperm.xlu1 %1266, %v1561_v23  }
 0x121   :  { %576 = vmatpush1.bf16.msra.mxu1 %v1305_v5 }
 0x122   :  { %622 = vmatprep.subr.bf16.mxu1 %v1310_v10 }
 0x124   :  { %1058 = vperm.xlu1 %1266, %v1573_v26  }
 0x1c4   :  { %v1251_v7 = vpop.f32.mrf.mxu1 }
 0x1c6   :  { %v323_v8 = vpop.f32.mrf.mxu1 }
 0x1c7   :  { %405 = vxpose.xlu0.b32.start [1/8] (short) (narrow) %v323_v8, 32 }
 0x1c8   :  { %v1252_v9 = vpop.f32.mrf.mxu1 }
 0x1ca   :  { %v326_v11 = vpop.f32.mrf.mxu1 }
 0x1cb   :  { %406 = vxpose.xlu0.b32.cont [2/8] (short) (narrow) %v326_v11, 32 }
 0x1cf   :  { %407 = vxpose.xlu0.b32.cont [3/8] (short) (narrow) %v1251_v7, 32  ;;  %v468_v7 = vpop.permute.xlu1 %467 }
 0x1d3   :  { %408 = vxpose.xlu0.b32.cont [4/8] (short) (narrow) %v1252_v9, 32  ;;  %v473_v19 = vpop.permute.xlu1 %472 }
 0x1d4   :  { %v1259_v12 = vpop.f32.mrf.mxu1 }
 0x1d6   :  { %v390_v13 = vpop.f32.mrf.mxu1 }
 0x1d7   :  { %409 = vxpose.xlu0.b32.cont [5/8] (short) (narrow) %v390_v13, 32 }
 0x1d8   :  { %v1260_v14 = vpop.f32.mrf.mxu1 }
 0x1da   :  { %v393_v15 = vpop.f32.mrf.mxu1 }
 0x1db   :  { %410 = vxpose.xlu0.b32.cont [6/8] (short) (narrow) %v393_v15, 32 }
 0x1df   :  { %411 = vxpose.xlu0.b32.cont [7/8] (short) (narrow) %v1259_v12, 32 }
 0x1e3   :  { %412 = vxpose.xlu0.b32.end [8/8] (short) (narrow) %v1260_v14, 32 }
 0x20c   :  { %1267 = vset.pattern.permute.xlu0 %v1375_v0 }
 0x243   :  { %v421_v30 = vpop.trf.xlu0 }
 0x247   :  { %v422_v31 = vpop.trf.xlu0 }
 0x248   :  { %v437_v33 = vpack.c.bf16 %v422_v31, %v421_v30 }
 0x24a   :  { %1145 = vmatmul.mubr.msk.bf16.vlgmr.msra.gmra.mxu1 %vm180_vm0, %v437_v33 }
 0x24b   :  { %623 = vmatpush1.bf16.msra.mxu1 %v1308_v32  ;;  %v423_v35 = vpop.trf.xlu0  ;;  %603 = vmatprep.mubr.bf16.mxu1 %v1374_v1 }
 0x24c   :  { %624 = vmatprep.subr.bf16.mxu1 %v1313_v34 }
 0x24f   :  { %625 = vmatpush1.bf16.msra.mxu1 %v1311_v36  ;;  %v424_v38 = vpop.trf.xlu0 }
 0x250   :  { %v438_v40 = vpack.c.bf16 %v424_v38, %v423_v35  ;;  %626 = vmatprep.subr.bf16.mxu1 %v1316_v37 }
 0x252   :  { %1146 = vmatmul.mubr.msk.bf16.gmra.mxu1 %vm180_vm0, %v438_v40 }
 0x253   :  { %627 = vmatpush1.bf16.msra.mxu1 %v1314_v39  ;;  %646 = vmatprep.mubr.bf16.mxu1 %v1374_v1 }
 0x254   :  { %628 = vmatprep.subr.bf16.mxu1 %v1319_v41 }
 0x257   :  { %629 = vmatpush1.bf16.msra.mxu1 %v1317_v42 }
 0x258   :  { %1217 = vmatprep.subr.bf16.mxu1 %v1329_v43 }
 0x25a   :  { %1147 = vmatmul.mubr.msk.bf16.vlgmr.msra.gmra.mxu1 %vm180_vm0, %v437_v33 }
 0x25b   :  { %656 = vmatprep.mubr.bf16.mxu1 %v1374_v1  ;;  %1218 = vmatpush3.bf16.msra.mxu1 %v1331_v44  ;;  %v1336_v1 = vld [vmem:[%s1692_s3 + $0x48] sm:$0xff]  }
 0x25c   :  { %1219 = vmatprep.subr.bf16.mxu1 %v1333_v46  ;;  %1201 = vmatprep.subr.bf16.mxu0 %v1336_v1 }
 0x25d   :  { %1202 = vmatpush3.bf16.msra.mxu0 %v1338_v50 }
 0x25e   :  { %1203 = vmatprep.subr.bf16.mxu0 %v1340_v52 }
 0x25f   :  { %1220 = vmatpush3.bf16.msra.mxu1 %v1335_v48 }
 0x260   :  { %1221 = vmatprep.subr.bf16.mxu1 %v1337_v49 }
 0x261   :  { %1204 = vmatpush3.bf16.msra.mxu0 %v1342_v54 }
 0x262   :  { %1148 = vmatmul.mubr.msk.bf16.gmra.mxu1 %vm180_vm0, %v438_v40 }
 0x263   :  { %1222 = vmatpush3.bf16.msra.mxu1 %v1339_v51 }
 0x264   :  { %1223 = vmatprep.subr.bf16.mxu1 %v1341_v53 }
 0x267   :  { %1224 = vmatpush3.bf16.msra.mxu1 %v1343_v55 }
 0x268   :  { %1225 = vmatprep.subr.bf16.mxu1 %v1344_v56 }
 0x26b   :  { %1226 = vmatpush3.bf16.msra.mxu1 %v1345_v57 }
 0x26c   :  { %1227 = vmatprep.subr.bf16.mxu1 %v1346_v58 }
 0x26f   :  { %1228 = vmatpush3.bf16.msra.mxu1 %v1347_v59 }
 0x270   :  { %1229 = vmatprep.subr.bf16.mxu1 %v1348_v60 }
 0x273   :  { %1230 = vmatpush3.bf16.msra.mxu1 %v1349_v61 }
 0x274   :  { %1231 = vmatprep.subr.bf16.mxu1 %v1350_v62 }
 0x277   :  { %1232 = vmatpush3.bf16.msra.mxu1 %v1351_v63 }
 0x30a   :  { %v595_v4 = vpop.f32.mrf.mxu1 }
 0x30b   :  { %v596_v10 = vadd.f32 %v595_v4, %v458_v2 }
 0x30c   :  { %v597_v5 = vpop.f32.mrf.mxu1 }
 0x30d   :  { %v598_v8 = vadd.f32 %v597_v5, %v458_v2  ;;  %v667_v17 = vmax.f32 %v596_v10, 0.0 }
 0x30e   :  { %v599_v6 = vpop.f32.mrf.mxu1 }
 0x30f   :  { %v600_v9 = vadd.f32 %v599_v6, %v463_v3  ;;  %v668_v15 = vmax.f32 %v598_v8, 0.0 }
 0x310   :  { %v601_v11 = vpop.f32.mrf.mxu1 }
 0x311   :  { %v602_v12 = vadd.f32 %v601_v11, %v463_v3  ;;  %v671_v13 = vmax.f32 %v600_v9, 0.0 }
 0x312   :  { %v605_v14 = vpop.f32.mrf.mxu1 }
 0x313   :  { %v672_v16 = vmax.f32 %v602_v12, 0.0  ;;  %v683_v21 = vpack.c.bf16 %v671_v13, %v667_v17  ;;  %v606_v25 = vadd.f32 %v605_v14, %v468_v7 }
 0x314   :  { %v607_v18 = vpop.f32.mrf.mxu1 }
 0x315   :  { %v684_v20 = vpack.c.bf16 %v672_v16, %v668_v15  ;;  %v608_v23 = vadd.f32 %v607_v18, %v468_v7  ;;  %v675_v32 = vmax.f32 %v606_v25, 0.0 }
 0x316   :  { %v609_v22 = vpop.f32.mrf.mxu1 }
 0x317   :  { %v610_v24 = vadd.f32 %v609_v22, %v473_v19  ;;  %979 = vmatprep.mubr.bf16.mxu0 %v684_v20  ;;  %v676_v30 = vmax.f32 %v608_v23, 0.0 }
 0x318   :  { %v611_v26 = vpop.f32.mrf.mxu1  ;;  %980 = vmatmul.mubr.bf16.vlgmr.msra.gmra.mxu0 %v683_v21 }
 0x319   :  { %v612_v27 = vadd.f32 %v611_v26, %v473_v19  ;;  %v679_v28 = vmax.f32 %v610_v24, 0.0 }
 0x31a   :  { %v648_v29 = vpop.f32.mrf.mxu1 }
 0x31b   :  { %v680_v31 = vmax.f32 %v612_v27, 0.0  ;;  %v687_v35 = vpack.c.bf16 %v679_v28, %v675_v32  ;;  %v649_v39 = vadd.f32 %v648_v29, %v458_v2 }
 0x31c   :  { %v650_v33 = vpop.f32.mrf.mxu1 }
 0x31d   :  { %v688_v34 = vpack.c.bf16 %v680_v31, %v676_v30  ;;  %v651_v37 = vadd.f32 %v650_v33, %v458_v2  ;;  %v669_v46 = vmax.f32 %v649_v39, 0.0  ;;  %v1047_v2 = vpop.permute.xlu1 %1046 }
 0x31e   :  { %v652_v36 = vpop.f32.mrf.mxu1 }
 0x31f   :  { %v653_v38 = vadd.f32 %v652_v36, %v463_v3  ;;  %987 = vmatprep.mubr.bf16.mxu0 %v688_v34  ;;  %v670_v44 = vmax.f32 %v651_v37, 0.0 }
 0x320   :  { %v654_v40 = vpop.f32.mrf.mxu1  ;;  %988 = vmatmul.mubr.bf16.gmra.mxu0 %v687_v35 }
 0x321   :  { %v655_v41 = vadd.f32 %v654_v40, %v463_v3  ;;  %v673_v42 = vmax.f32 %v653_v38, 0.0  ;;  %v1051_v8 = vpop.permute.xlu1 %1050 }
 0x322   :  { %v658_v43 = vpop.f32.mrf.mxu1 }
 0x323   :  { %v674_v45 = vmax.f32 %v655_v41, 0.0  ;;  %v685_v1 = vpack.c.bf16 %v673_v42, %v669_v46  ;;  %v659_v52 = vadd.f32 %v658_v43, %v468_v7  ;;  %v59_v46 = vld [vmem:[%s1693_s4 + $0x21] sm:$0x1] }
 0x324   :  { %v660_v47 = vpop.f32.mrf.mxu1 }
 0x325   :  { %v686_v48 = vpack.c.bf16 %v674_v45, %v670_v44  ;;  %v661_v50 = vadd.f32 %v660_v47, %v468_v7  ;;  %v677_v58 = vmax.f32 %v659_v52, 0.0  ;;  %v1055_v20 = vpop.permute.xlu1 %1054 }
 0x326   :  { %v662_v49 = vpop.f32.mrf.mxu1 }
 0x327   :  { %v663_v51 = vadd.f32 %v662_v49, %v473_v19  ;;  %1028 = vmatprep.mubr.bf16.mxu1 %v686_v48  ;;  %v678_v56 = vmax.f32 %v661_v50, 0.0 }
 0x328   :  { %v664_v53 = vpop.f32.mrf.mxu1  ;;  %1029 = vmatmul.mubr.bf16.vlgmr.msra.gmra.mxu1 %v685_v1 }
 0x329   :  { %v665_v54 = vadd.f32 %v664_v53, %v473_v19  ;;  %v681_v55 = vmax.f32 %v663_v51, 0.0  ;;  %v1059_v35 = vpop.permute.xlu1 %1058 }
 0x32b   :  { %v682_v57 = vmax.f32 %v665_v54, 0.0  ;;  %v689_v60 = vpack.c.bf16 %v681_v55, %v677_v58 }
 0x32d   :  { %v690_v59 = vpack.c.bf16 %v682_v57, %v678_v56 }
 0x32f   :  { %1036 = vmatprep.mubr.bf16.mxu1 %v690_v59 }
 0x330   :  { %1037 = vmatmul.mubr.bf16.gmra.mxu1 %v689_v60 }
 0x3d8   :  { %v1205_v61 = vpop.f32.mrf.mxu0 }
 0x3da   :  { %v1206_v62 = vpop.f32.mrf.mxu0 }
 0x3db   :  { %v1207_v11 = vadd.f32 %v1206_v62, %v1205_v61 }
 0x3dc   :  { %v1208_v63 = vpop.f32.mrf.mxu0 }
 0x3de   :  { %v1209_v0 = vpop.f32.mrf.mxu0 }
 0x3df   :  { %v1210_v12 = vadd.f32 %v1209_v0, %v1208_v63 }
 0x3e0   :  { %v1211_v3 = vpop.f32.mrf.mxu0 }
 0x3e2   :  { %v1212_v6 = vpop.f32.mrf.mxu0 }
 0x3e3   :  { %v1213_v19 = vadd.f32 %v1212_v6, %v1211_v3 }
 0x3e4   :  { %v1214_v14 = vpop.f32.mrf.mxu0 }
 0x3e6   :  { %v1215_v23 = vpop.f32.mrf.mxu0 }
 0x3e7   :  { %v1216_v28 = vadd.f32 %v1215_v23, %v1214_v14 }
 0x3e8   :  { %v1233_v4 = vpop.f32.mrf.mxu1 }
 0x3ea   :  { %v1234_v5 = vpop.f32.mrf.mxu1 }
 0x3eb   :  { %v1235_v9 = vadd.f32 %v1234_v5, %v1233_v4 }
 0x3ec   :  { %v1236_v7 = vpop.f32.mrf.mxu1 }
 0x3ed   :  { %v1031_v16 = vadd.f32 %v1235_v9, %v1207_v11 }
 0x3ee   :  { %v1237_v10 = vpop.f32.mrf.mxu1 }
 0x3ef   :  { %v1238_v13 = vadd.f32 %v1237_v10, %v1236_v7  ;;  %v1061_v25 = vmul.f32 %v1047_v2, %v1031_v16 }
 0x3f0   :  { %v1239_v15 = vpop.f32.mrf.mxu1 }
 0x3f1   :  { %v1034_v17 = vadd.f32 %v1238_v13, %v1210_v12  ;;  %v1066_v32 = vsel %vm1065_vm2, %v1061_v25, 0.0 }
 0x3f2   :  { %v1240_v18 = vpop.f32.mrf.mxu1 }
 0x3f3   :  { %v1062_v21 = vmul.f32 %v1051_v8, %v1034_v17  ;;  %v1241_v22 = vadd.f32 %v1240_v18, %v1239_v15 }
 0x3f4   :  { %v1242_v24 = vpop.f32.mrf.mxu1 }
 0x3f5   :  { %v1039_v26 = vadd.f32 %v1241_v22, %v1213_v19  ;;  %v1067_v29 = vsel %vm1065_vm2, %v1062_v21, 0.0 }
 0x3f6   :  { %v1243_v27 = vpop.f32.mrf.mxu1  ;;  %v1068_v36 = vadd.f32 %v1067_v29, %v1066_v32 }
 0x3f7   :  { %v1063_v30 = vmul.f32 %v1055_v20, %v1039_v26  ;;  %v1244_v31 = vadd.f32 %v1243_v27, %v1242_v24 }
 0x3f9   :  { %v1069_v33 = vsel %vm1065_vm2, %v1063_v30, 0.0  ;;  %v1042_v34 = vadd.f32 %v1244_v31, %v1216_v28 }
 0x3fa   :  { %v1070_v38 = vadd.f32 %v1069_v33, %v1068_v36 }
 0x3fb   :  { %v1064_v37 = vmul.f32 %v1059_v35, %v1042_v34 }
 0x3fd   :  { %v1071_v39 = vsel %vm1065_vm2, %v1064_v37, 0.0 }
 0x3fe   :  { %v1072_v40 = vadd.f32 %v1071_v39, %v1070_v38 }
 0x400   :  { %v1073_v41 = vrot.slane %v1072_v40, 4 }
 0x402   :  { %v1074_v42 = vadd.f32 %v1073_v41, %v1072_v40 }
 0x404   :  { %v1075_v43 = vrot.slane %v1074_v42, 2 }
 0x406   :  { %v1076_v44 = vadd.f32 %v1075_v43, %v1074_v42 }
 0x408   :  { %v1077_v45 = vrot.slane %v1076_v44, 1 }
 0x40a   :  { %v1078_v47 = vadd.f32 %v1077_v45, %v1076_v44 }
 0x40c   :  { %v1079_v48 = vadd.f32 %v1078_v47, %v59_v46 }
 0x40e   :  { %1081 = vst.msk [vmem:[#allocation2] sm:$0x1] %vm1080_vm3, %v1079_v48 }
 0x40f   :  { %1363 = shalt.err (!%p1360_p4)
}
 0x410   :  { %1091 = dma.vmem_to_hbm [thread:$0]  %s1089_s14, 16, %s1694_s5, [#allocation3]  }
 0x411   :  { %1372 = dma.done.wait [#allocation3], 16  }
 0x412   :  { %1373 = vsyncadd [#allocation3], 4294967280 }
 0x413   :  { %1095 = vsyncpa [#allocation3], 1 }

</bundles_post_ra>
